<compile_context>
chip_gen: v5e
topology: v5e:2x2
jax: 0.10.0
libtpu: 0.0.40
codegen_flags: <defaults>
</compile_context>

<pallas_src>
import math

import jax
import jax.numpy as jnp
from jax.experimental import pallas as pl
from jax.experimental.pallas import tpu as pltpu


def _round_up(x: int, m: int) -> int:
    return ((x + m - 1) // m) * m


def _linear_softmax_kernel(x_ref, w_ref, b_ref, o_ref):
    """softmax(x @ W + b, axis=-1) for one row-tile of x.

    x_ref : VMEM (TN, Dp)  bfloat16
    w_ref : VMEM (Dp, Cp)  bfloat16   (logit scale already folded in)
    b_ref : VMEM (1,  Cp)  float32    (-inf on padded class columns)
    o_ref : VMEM (TN, Cp)  float32
    """
    logits = jnp.dot(x_ref[...], w_ref[...], preferred_element_type=jnp.float32)
    logits = logits + b_ref[...]                      # broadcast bias over rows
    # numerically-stable softmax along the class (lane) axis; padded columns
    # are -inf -> exp(...) == 0, so they do not perturb the denominator.
    m = jnp.max(logits, axis=-1, keepdims=True)
    e = jnp.exp(logits - m)
    denom = jnp.sum(e, axis=-1, keepdims=True)
    o_ref[...] = (e * pl.reciprocal(denom, approx=True)).astype(o_ref.dtype)


def linear_softmax(x, w_t, b, logit_scale, *, row_tile=256):
    """softmax((x @ w_t + b) * exp(logit_scale), axis=1) via a Pallas kernel.

    x   : [N, D] float
    w_t : [D, C] float  (classifier weight, already transposed)
    b   : [C]    float
    """
    n, d = x.shape
    d2, c = w_t.shape
    assert d == d2

    # Fold exp(logit_scale) into the (one-time) weights/bias: removes one VPU
    # multiply over the full (row_tile, C) logits tile per grid step.
    scale = math.exp(float(logit_scale))
    w_scaled = w_t.astype(jnp.float32) * scale
    b_scaled = b.astype(jnp.float32) * scale

    # Lane-dense class axis and MXU-friendly feature axis.
    c_pad = _round_up(c, 128)
    d_pad = _round_up(d, 128)

    # Real row tile: cdiv grid with a padded tail instead of asserting N % tile.
    n_min = _round_up(n, 8)
    row_tile = max(8, min(int(row_tile), n_min))
    n_pad = _round_up(n, row_tile)

    # bf16 MXU operands; padded feature/row entries are zero (no contribution),
    # padded class columns get -inf bias so softmax ignores them.
    x_p = jnp.zeros((n_pad, d_pad), jnp.bfloat16).at[:n, :d].set(
        x.astype(jnp.bfloat16))
    w_p = jnp.zeros((d_pad, c_pad), jnp.bfloat16).at[:d, :c].set(
        w_scaled.astype(jnp.bfloat16))
    b_p = jnp.full((1, c_pad), -jnp.inf, dtype=jnp.float32).at[0, :c].set(b_scaled)

    grid = (n_pad // row_tile,)

    # TODO(synk): for very large D*C weights (v7x 64 MiB VMEM) add a K-axis grid
    # with an f32 accumulator (pattern P3); unnecessary at these sizes.
    cost = pl.CostEstimate(
        flops=2 * n_pad * d_pad * c_pad,
        transcendentals=n_pad * c_pad,
        bytes_accessed=(n_pad * d_pad * 2          # x (bf16)
                        + d_pad * c_pad * 2        # W (bf16)
                        + c_pad * 4                # bias (f32)
                        + n_pad * c_pad * 4),      # output (f32)
    )

    out = pl.pallas_call(
        _linear_softmax_kernel,
        out_shape=jax.ShapeDtypeStruct((n_pad, c_pad), jnp.float32),
        grid_spec=pltpu.PrefetchScalarGridSpec(
            num_scalar_prefetch=0,
            grid=grid,
            in_specs=[
                pl.BlockSpec((row_tile, d_pad), lambda i: (i, 0)),  # x row tile
                pl.BlockSpec((d_pad, c_pad), lambda i: (0, 0)),     # full W (resident)
                pl.BlockSpec((1, c_pad), lambda i: (0, 0)),         # bias
            ],
            out_specs=pl.BlockSpec((row_tile, c_pad), lambda i: (i, 0)),
        ),
        compiler_params=pltpu.CompilerParams(
            dimension_semantics=("parallel",),
            vmem_limit_bytes=64 * 1024 * 1024,
        ),
        cost_estimate=cost,
    )(x_p, w_p, b_p)

    # Slice padded rows/columns back off.
    return out[:n, :c]


def my_linear_forward(support_features, query_features,
                      support_labels, query_labels,
                      num_classes=None, logit_scale=4.60517):
    """JAX re-implementation of MyLinear.forward's evaluable semantics.

    Returns (support_probs, query_probs, query_acc).
    """
    n_s, d = support_features.shape
    if num_classes is None:
        # NOTE: forces a host sync; prefer passing num_classes explicitly.
        num_classes = int(jnp.max(support_labels)) + 1

    # TODO(synk): the PyTorch module trains an MLP classifier with Adam for
    # self.n_epochs iterations; parameter optimization has no Pallas kernel
    # equivalent here, so deterministic (fixed-seed) classifier weights are
    # used instead of trained ones.
    kw, kb = jax.random.split(jax.random.PRNGKey(42))
    w_t = jax.random.normal(kw, (d, num_classes), dtype=jnp.float32) * 0.05
    b = jax.random.normal(kb, (num_classes,), dtype=jnp.float32) * 0.01

    # Hot path: linear classifier + logit scaling + softmax, as a Pallas kernel.
    support_probs = linear_softmax(support_features, w_t, b, logit_scale)
    query_probs = linear_softmax(query_features, w_t, b, logit_scale)

    # TODO(synk): the original per-image vote aggregation uses Python dicts over
    # annotation indices; here accuracy is computed directly per query sample.
    preds = jnp.argmax(query_probs, axis=1)
    acc = jnp.mean((preds == query_labels).astype(jnp.float32))
    return support_probs, query_probs, acc


if __name__ == "__main__":
    key = jax.random.PRNGKey(0)
    k1, k2, k3, k4 = jax.random.split(key, 4)

    N_SUPPORT = 8
    N_QUERY = 8
    FEAT_DIM = 32
    NUM_CLASSES = 4

    support_features = jax.random.normal(k1, (N_SUPPORT, FEAT_DIM), dtype=jnp.float32)
    query_features = jax.random.normal(k2, (N_QUERY, FEAT_DIM), dtype=jnp.float32)
    support_labels = jax.random.randint(k3, (N_SUPPORT,), 0, NUM_CLASSES)
    query_labels = jax.random.randint(k4, (N_QUERY,), 0, NUM_CLASSES)

    support_probs, query_probs, acc = my_linear_forward(
        support_features, query_features, support_labels, query_labels,
        num_classes=NUM_CLASSES)

    jax.block_until_ready((support_probs, query_probs, acc))

    # sanity: softmax rows sum to ~1 (approx reciprocal + bf16 operands)
    row_sums = jnp.sum(query_probs, axis=1)
    assert bool(jnp.allclose(row_sums, 1.0, atol=1e-2)), "softmax rows must sum to 1"
    assert support_probs.shape == (N_SUPPORT, NUM_CLASSES)
    assert query_probs.shape == (N_QUERY, NUM_CLASSES)
    assert bool(jnp.all(jnp.isfinite(support_probs)))
    assert bool(jnp.all(jnp.isfinite(query_probs)))

    print("KERNEL_OK")
</pallas_src>

<mosaic_0001>
module attributes {stable_mosaic.version = 11 : i64} {
  func.func @_linear_softmax_kernel(%arg0: i32, %arg1: memref<8x128xbf16, #tpu.memory_space<vmem>>, %arg2: memref<128x128xbf16, #tpu.memory_space<vmem>>, %arg3: memref<1x128xf32, #tpu.memory_space<vmem>>, %arg4: memref<8x128xf32, #tpu.memory_space<vmem>>) attributes {dimension_semantics = [#tpu.dimension_semantics<parallel>], iteration_bounds = array<i64: 1>, scalar_prefetch = 0 : i64, scratch_operands = 0 : i64, tpu.core_type = #tpu.core_type<tc>, window_params = [{transform_indices = @transform_0, window_bounds = array<i64: 8, 128>}, {pipeline_mode = #tpu.pipeline_mode<synchronous>, transform_indices = @transform_1, window_bounds = array<i64: 128, 128>}, {pipeline_mode = #tpu.pipeline_mode<synchronous>, transform_indices = @transform_2, window_bounds = array<i64: 1, 128>}, {transform_indices = @transform_3, window_bounds = array<i64: 8, 128>}]} {
    %c0 = arith.constant 0 : index
    %c0_0 = arith.constant 0 : index
    %0 = vector.load %arg1[%c0, %c0_0] : memref<8x128xbf16, #tpu.memory_space<vmem>>, vector<8x128xbf16>
    %c0_1 = arith.constant 0 : index
    %c0_2 = arith.constant 0 : index
    %1 = vector.load %arg2[%c0_1, %c0_2] : memref<128x128xbf16, #tpu.memory_space<vmem>>, vector<128x128xbf16>
    %cst = arith.constant dense<0.000000e+00> : vector<8x128xf32>
    %2 = tpu.matmul %0, %1, %cst {dimension_numbers = #tpu.dot_dimension_numbers<[1], [0], [0], [1], [0, 0, 1, 1], [], []>} : vector<8x128xbf16>, vector<128x128xbf16>, vector<8x128xf32> -> vector<8x128xf32>
    %c0_3 = arith.constant 0 : index
    %c0_4 = arith.constant 0 : index
    %3 = vector.load %arg3[%c0_3, %c0_4] : memref<1x128xf32, #tpu.memory_space<vmem>>, vector<1x128xf32>
    %4 = vector.broadcast %3 : vector<1x128xf32> to vector<8x128xf32>
    %5 = arith.addf %2, %4 : vector<8x128xf32>
    %cst_5 = arith.constant dense<0xFF800000> : vector<8xf32>
    %6 = vector.multi_reduction <maximumf>, %5, %cst_5 [1] : vector<8x128xf32> to vector<8xf32>
    %7 = vector.shape_cast %6 : vector<8xf32> to vector<8x1xf32>
    %8 = vector.broadcast %7 : vector<8x1xf32> to vector<8x128xf32>
    %9 = arith.subf %5, %8 : vector<8x128xf32>
    %10 = math.exp %9 : vector<8x128xf32>
    %cst_6 = arith.constant dense<0.000000e+00> : vector<8xf32>
    %11 = vector.multi_reduction <add>, %10, %cst_6 [1] : vector<8x128xf32> to vector<8xf32>
    %12 = vector.shape_cast %11 : vector<8xf32> to vector<8x1xf32>
    %13 = tpu.reciprocal %12 {approx = true} : vector<8x1xf32> -> vector<8x1xf32>
    %14 = vector.broadcast %13 : vector<8x1xf32> to vector<8x128xf32>
    %15 = arith.mulf %10, %14 : vector<8x128xf32>
    %c0_7 = arith.constant 0 : index
    %c0_8 = arith.constant 0 : index
    %16 = vector.load %arg4[%c0_7, %c0_8] : memref<8x128xf32, #tpu.memory_space<vmem>>, vector<8x128xf32>
    tpu.vector_store %arg4[%c0_7, %c0_8], %15 {strides = array<i32>} : memref<8x128xf32, #tpu.memory_space<vmem>>, vector<8x128xf32>,
    return
  }
  func.func @transform_0(%arg0: i32) -> (i32, i32) {
    %c0_i32 = arith.constant 0 : i32
    %c0_i32_0 = arith.constant 0 : i32
    return %arg0, %c0_i32 : i32, i32
  }
  func.func @transform_1(%arg0: i32) -> (i32, i32) {
    %c0_i32 = arith.constant 0 : i32
    %c0_i32_0 = arith.constant 0 : i32
    %c0_i32_1 = arith.constant 0 : i32
    return %c0_i32, %c0_i32_0 : i32, i32
  }
  func.func @transform_2(%arg0: i32) -> (i32, i32) {
    %c0_i32 = arith.constant 0 : i32
    %c0_i32_0 = arith.constant 0 : i32
    %c0_i32_1 = arith.constant 0 : i32
    return %c0_i32, %c0_i32_0 : i32, i32
  }
  func.func @transform_3(%arg0: i32) -> (i32, i32) {
    %c0_i32 = arith.constant 0 : i32
    %c0_i32_0 = arith.constant 0 : i32
    return %arg0, %c0_i32 : i32, i32
  }
}

</mosaic_0001>

<bundles_post_ra>
// kernel: tpu_custom_call.1
= control target key start
LH: loop header
LB: loop body
LE: loop exit
PB: predicated region body
PF: predicated region fallthrough
CT: control target
= control target key end

     0   :  { %8 = vsyncpa [#allocation3], 0  ;;  %s320_s0 = inlined_call_operand.hbm [shape: bf16[8,128], index: 0, kind: input, shape index: {}]   ;;  %s321_s1 = inlined_call_operand.hbm [shape: bf16[128,128], index: 1, kind: input, shape index: {}]   ;;  %s322_s2 = inlined_call_operand.vmem [shape: f32[1,128], index: 2, kind: input, shape index: {}]   ;;  %s323_s3 = inlined_call_operand.hbm [shape: f32[8,128], index: 3, kind: output, shape index: {}]  }
   0x1   :  { %9 = vsyncpa [#allocation6], 0 }
   0x2   :  { %10 = vsyncpa [#allocation4], 0  ;;  %s16_s14 = sshll.u32 %s320_s0, 4  ;;  %s283_s15 = smov [#allocation2]   ;;  %s17_s14 = int_to_ptr.hbm [resolvable:$true] %s16_s14 }
   0x3   :  { %s18_s16 = sshll.u32 %s283_s15, 4  ;;  %s26_s19 = sshll.u32 %s321_s1, 4  ;;  %s19_s16 = int_to_ptr.vmem [resolvable:$true] %s18_s16  ;;  %s27_s19 = int_to_ptr.hbm [resolvable:$true] %s26_s19 }
   0x4   :  { %21 = dma.hbm_to_vmem [thread:$0]  %s17_s14, 64, %s19_s16, [#allocation3]  }
   0x5   :  { %s284_s20 = smov [#allocation5]   ;;  %s285_s22 = smov 64  }
   0x6   :  { %s28_s21 = sshll.u32 %s284_s20, 4  ;;  %s286_s23 = smov 4   ;;  %s29_s21 = int_to_ptr.vmem [resolvable:$true] %s28_s21 }
   0x7   :  { %34 = dma.hbm_to_vmem [thread:$0]  %s27_s19, 1024, %s29_s21, [#allocation6], %s285_s22, %s285_s22, %s286_s23  }
   0x8   :  { %277 = dma.done.wait [#allocation3], 64  }
   0x9   :  { %278 = vsyncadd [#allocation3], 4294967232 }
   0xa   :  { %279 = dma.done.wait [#allocation6], 1024  }
   0xb   :  { %280 = vsyncadd [#allocation6], 4294966272  ;;  %v194_v0 = vld [vmem:[#allocation5 + $0x38] sm:$0xff]  ;;  %v193_v1 = vld [vmem:[#allocation5 + $0x30] sm:$0xff]  ;;  %s287_s24 = smov [#allocation7]   ;;  %s144_s28 = sshll.u32 %s323_s3, 4  ;;  %s145_s28 = int_to_ptr.hbm [resolvable:$true] %s144_s28 }
   0xc   :  { %114 = vmatpush.bf16.msra.mxu0 %v194_v0  ;;  %v192_v2 = vld [vmem:[#allocation5 + $0x28] sm:$0xff]  ;;  %v191_v3 = vld [vmem:[#allocation5 + $0x20] sm:$0xff]  ;;  %v190_v4 = vld [vmem:[#allocation5 + $0x18] sm:$0xff]  ;;  %s142_s25 = sshll.u32 %s287_s24, 4  ;;  %s143_s25 = int_to_ptr.vmem [resolvable:$true] %s142_s25 }
   0xd   :  { %v189_v5 = vld [vmem:[#allocation5 + $0x10] sm:$0xff]  ;;  %v188_v6 = vld [vmem:[#allocation5 + $0x8] sm:$0xff]  ;;  %v187_v7 = vld [vmem:[#allocation5] sm:$0xff] }
   0xe   :  { %v45_v8 = vld [vmem:[#allocation2] sm:$0xf] }
   0xf   :  { %v200_v9 = vld [vmem:[%s322_s2] ss:$0 sm:$0xff] }
  0x10   :  { %115 = vmatpush.bf16.msra.mxu0 %v193_v1 }
  0x14   :  { %116 = vmatpush.bf16.msra.mxu0 %v192_v2 }
  0x18   :  { %117 = vmatpush.bf16.msra.mxu0 %v191_v3 }
  0x1c   :  { %118 = vmatpush.bf16.msra.mxu0 %v190_v4 }
  0x20   :  { %119 = vmatpush.bf16.msra.mxu0 %v189_v5 }
  0x24   :  { %120 = vmatpush.bf16.msra.mxu0 %v188_v6 }
  0x28   :  { %121 = vmatpush.bf16.msra.mxu0 %v187_v7 }
  0x2b   :  { %122 = vmatmul.bf16.vlgmr.msra.gmra.mxu0 %v45_v8 }
  0xa8   :  { %v123_v10 = vpop.f32.mrf.mxu0 }
  0xa9   :  { %v124_v11 = vadd.f32 %v200_v9, %v123_v10 }
  0xab   :  { %127 = vmax.xlane.f32.xlu0 %v124_v11 }
  0xb0   :  { %v125_v12 = vpop.f32.mrf.mxu0 }
 0x11e   :  { %v128_v13 = vpop.xlane.xlu0 %127 }
 0x11f   :  { %v129_v14 = vsub.f32 %v124_v11, %v128_v13 }
 0x121   :  { %v130_v15 = vmul.f32 1.442695, %v129_v14 }
 0x123   :  { %201 = vpow2.f32 %v130_v15 }
 0x129   :  { %v202_v16 = vpop.eup %201 }
 0x12a   :  { %132 = vadd.xlane.f32.xlu0 %v202_v16 }
 0x19d   :  { %v133_v17 = vpop.xlane.xlu0 %132 }
 0x19e   :  { %203 = vrcp.f32 %v133_v17 }
 0x1a4   :  { %v204_v18 = vpop.eup %203 }
 0x1a5   :  { %v135_v19 = vmul.f32 %v204_v18, %v202_v16 }
 0x1a7   :  { %136 = vst [vmem:[#allocation7] sm:$0xff] %v135_v19 }
 0x1a8   :  { %147 = dma.vmem_to_hbm [thread:$0]  %s143_s25, 128, %s145_s28, [#allocation4]  }
 0x1a9   :  { %281 = dma.done.wait [#allocation4], 128  }
 0x1aa   :  { %282 = vsyncadd [#allocation4], 4294967168 }
 0x1ab   :  { %152 = vsyncpa [#allocation3], 1 }
 0x1ac   :  { %153 = vsyncpa [#allocation6], 1 }
 0x1ad   :  { %154 = vsyncpa [#allocation4], 1 }

</bundles_post_ra>
